<compile_context>
chip_gen: v5e
topology: v5e:2x2
jax: 0.10.0
libtpu: 0.0.40
codegen_flags: <defaults>
</compile_context>

<pallas_src>
import functools

import jax
import jax.numpy as jnp
import numpy as np
from jax.experimental import pallas as pl
from jax.experimental.pallas import tpu as pltpu


def _round_up(n, m):
    return ((n + m - 1) // m) * m


# ----------------------------------------------------------------------------
# Kernel: one (output-channel block, batch block) tile per grid step.
# ----------------------------------------------------------------------------
def _biaffine_kernel(x_ref, yt_ref, wr_ref, s_ref):
    # x_ref : (b_block * nx_p, dx_p)          bf16 -- batch rows stacked
    # yt_ref: (b_block, dy_p, ny_p)           bf16 -- y pre-transposed (wrapper)
    # wr_ref: (dx_p, o_block * dy_p)          bf16 -- W[o] blocks side by side
    # s_ref : (b_block, o_block, nx_p, ny_p)  f32
    b_block, o_block, nx_p, _ = s_ref.shape
    dy_p = yt_ref.shape[1]

    # One large lane-dense MXU call covering all batch rows and all output
    # channels of this block: (b_block*nx_p, dx_p) @ (dx_p, o_block*dy_p),
    # f32 accumulation.
    xw_all = jnp.dot(x_ref[...], wr_ref[...],
                     preferred_element_type=jnp.float32)
    xw_all = xw_all.astype(wr_ref.dtype)   # back to bf16 for the 2nd MXU pass

    # Small static loops (b_block, o_block <= 8 by construction, so trace size
    # and vreg live ranges stay bounded).  Slices are sublane-aligned
    # (nx_p % 8 == 0) and lane-aligned (dy_p % 128 == 0) -> no relayout cost.
    for b in range(b_block):
        yt_b = yt_ref[b]                                       # (dy_p, ny_p)
        xw_b = xw_all[b * nx_p:(b + 1) * nx_p, :]
        for o in range(o_block):
            xw_bo = xw_b[:, o * dy_p:(o + 1) * dy_p]           # (nx_p, dy_p)
            s_ref[b, o] = jnp.dot(
                xw_bo, yt_b, preferred_element_type=jnp.float32
            ).astype(s_ref.dtype)


# ----------------------------------------------------------------------------
# Block-size selection against a VMEM budget (double-buffered pipeline).
# ----------------------------------------------------------------------------
def _choose_blocks(B, O, nx_p, ny_p, dx_p, dy_p, vmem_budget_bytes):
    b_block = min(B, 8)
    o_block = min(O, 8)

    def footprint(bb, ob):
        in_b, out_b, acc_b = 2, 4, 4
        x = bb * nx_p * dx_p * in_b
        yt = bb * dy_p * ny_p * in_b
        w = dx_p * ob * dy_p * in_b
        out = bb * ob * nx_p * ny_p * out_b
        xw = bb * nx_p * ob * dy_p * acc_b          # in-kernel intermediate
        return 2 * (x + yt + w + out) + xw          # x2: double buffering

    while footprint(b_block, o_block) > vmem_budget_bytes and (
            b_block > 1 or o_block > 1):
        if o_block >= b_block and o_block > 1:
            o_block = max(1, o_block // 2)
        else:
            b_block = max(1, b_block // 2)
    return b_block, o_block


# ----------------------------------------------------------------------------
# Wrapper (jitted): bias append, bf16 cast, zero-pad, layout plumbing,
# pallas_call, output slice / permute / squeeze.
# ----------------------------------------------------------------------------
@functools.partial(
    jax.jit,
    static_argnames=("bias_x", "bias_y", "o_block", "b_block",
                     "vmem_limit_bytes"))
def biaffine_forward(x, y, weight, *, bias_x=True, bias_y=True,
                     o_block=None, b_block=None,
                     vmem_limit_bytes=48 * 1024 * 1024):
    """Biaffine.forward: x (B, nx, D), y (B, ny, D), weight (O, D+bx, D+by)."""
    x = jnp.asarray(x, jnp.float32)
    y = jnp.asarray(y, jnp.float32)
    weight = jnp.asarray(weight, jnp.float32)

    if bias_x:
        x = jnp.concatenate([x, jnp.ones((*x.shape[:-1], 1), x.dtype)], -1)
    if bias_y:
        y = jnp.concatenate([y, jnp.ones((*y.shape[:-1], 1), y.dtype)], -1)

    B, nx, dx = x.shape
    _, ny, dy = y.shape
    O = weight.shape[0]
    assert weight.shape == (O, dx, dy)
    assert y.shape[0] == B

    # (8,128)-aligned padded extents (lane dims -> 128, sublane dims -> 8).
    nx_p = _round_up(nx, 8)
    ny_p = _round_up(ny, 128)
    dx_p = _round_up(dx, 128)
    dy_p = _round_up(dy, 128)

    if b_block is None or o_block is None:
        bb, ob = _choose_blocks(B, O, nx_p, ny_p, dx_p, dy_p,
                                int(0.75 * vmem_limit_bytes))
        b_block = bb if b_block is None else b_block
        o_block = ob if o_block is None else o_block
    B_p = _round_up(B, b_block)
    O_p = _round_up(O, o_block)

    # Zero-padded bf16 operands (exact: padded rows/cols contribute zeros and
    # are sliced off the output below).
    xb = jnp.pad(x.astype(jnp.bfloat16),
                 ((0, B_p - B), (0, nx_p - nx), (0, dx_p - dx)))
    yb = jnp.pad(y.astype(jnp.bfloat16),
                 ((0, B_p - B), (0, ny_p - ny), (0, dy_p - dy)))
    wb = jnp.pad(weight.astype(jnp.bfloat16),
                 ((0, O_p - O), (0, dx_p - dx), (0, dy_p - dy)))

    # Wrapper-side layout plumbing (fuses under jit; no in-kernel XLU work):
    x_flat = xb.reshape(B_p * nx_p, dx_p)                     # batch rows stacked
    y_t = jnp.transpose(yb, (0, 2, 1))                        # (B_p, dy_p, ny_p)
    w_r = jnp.transpose(wb, (1, 0, 2)).reshape(dx_p, O_p * dy_p)

    grid = (O_p // o_block, B_p // b_block)   # o outer, batch inner -> weight
                                              # block stays VMEM-resident.

    s = pl.pallas_call(
        _biaffine_kernel,
        out_shape=jax.ShapeDtypeStruct((B_p, O_p, nx_p, ny_p), jnp.float32),
        grid_spec=pltpu.PrefetchScalarGridSpec(
            num_scalar_prefetch=0,
            grid=grid,
            in_specs=[
                pl.BlockSpec((b_block * nx_p, dx_p),
                             lambda ob, bb: (bb, 0)),           # x rows
                pl.BlockSpec((b_block, dy_p, ny_p),
                             lambda ob, bb: (bb, 0, 0)),        # y^T
                pl.BlockSpec((dx_p, o_block * dy_p),
                             lambda ob, bb: (0, ob)),           # W block (o only)
            ],
            out_specs=pl.BlockSpec((b_block, o_block, nx_p, ny_p),
                                   lambda ob, bb: (bb, ob, 0, 0)),
        ),
        compiler_params=pltpu.CompilerParams(
            dimension_semantics=("parallel", "parallel"),
            vmem_limit_bytes=vmem_limit_bytes,
        ),
    )(x_flat, y_t, w_r)

    # Drop padding first (cheapens the permute), then match the module layout.
    s = s[:B, :O, :nx, :ny]
    s = jnp.transpose(s, (0, 2, 3, 1))        # (B, nx, ny, O)
    if O == 1:
        s = s[..., 0]                         # squeeze_(-1)
    return s


# ----------------------------------------------------------------------------
# Parameter init (matches Biaffine.reset_parameters: xavier_uniform_ with
# gain = calculate_gain('leaky_relu', 0.1)) and a pure-JAX reference.
# ----------------------------------------------------------------------------
def init_biaffine_weight(key, input_dim, output_dim, *, bias_x=True,
                         bias_y=True, negative_slope=0.1):
    dx = input_dim + int(bias_x)
    dy = input_dim + int(bias_y)
    gain = float(np.sqrt(2.0 / (1.0 + negative_slope ** 2)))
    fan_in = dx * dy                      # PyTorch fan for a (O, dx, dy) tensor
    fan_out = output_dim * dy
    a = gain * float(np.sqrt(6.0 / (fan_in + fan_out)))
    return jax.random.uniform(key, (output_dim, dx, dy), jnp.float32, -a, a)


def biaffine_reference(x, y, weight, *, bias_x=True, bias_y=True):
    x = jnp.asarray(x, jnp.float32)
    y = jnp.asarray(y, jnp.float32)
    if bias_x:
        x = jnp.concatenate([x, jnp.ones((*x.shape[:-1], 1), x.dtype)], -1)
    if bias_y:
        y = jnp.concatenate([y, jnp.ones((*y.shape[:-1], 1), y.dtype)], -1)
    s = jnp.einsum("bia,oac,bjc->bijo", x, weight, y)
    if weight.shape[0] == 1:
        s = s[..., 0]
    return s


# ----------------------------------------------------------------------------
if __name__ == "__main__":
    key = jax.random.PRNGKey(0)
    kx, ky, kw_arc, kw_rel, kx2, ky2, kw2 = jax.random.split(key, 7)

    # Case 1/2: parser-like shapes, aligned-ish.
    B, n, input_dim = 2, 8, 32
    num_labels = 4
    x = jax.random.normal(kx, (B, n, input_dim), jnp.float32)
    y = jax.random.normal(ky, (B, n, input_dim), jnp.float32)
    w_arc = init_biaffine_weight(kw_arc, input_dim, 1)            # (1, 33, 33)
    w_rel = init_biaffine_weight(kw_rel, input_dim, num_labels)   # (4, 33, 33)

    s_arc = biaffine_forward(x, y, w_arc)      # (B, n, n)     (O==1 -> squeeze)
    s_rel = biaffine_forward(x, y, w_rel)      # (B, n, n, num_labels)

    # Case 3: deliberately ragged shapes to exercise the padding path.
    B2, n2, O2 = 3, 11, 5
    x2 = jax.random.normal(kx2, (B2, n2, input_dim), jnp.float32)
    y2 = jax.random.normal(ky2, (B2, n2, input_dim), jnp.float32)
    w2 = init_biaffine_weight(kw2, input_dim, O2)                 # (5, 33, 33)
    s2 = biaffine_forward(x2, y2, w2)          # (3, 11, 11, 5)

    jax.block_until_ready((s_arc, s_rel, s2))

    assert s_arc.shape == (B, n, n)
    assert s_rel.shape == (B, n, n, num_labels)
    assert s2.shape == (B2, n2, n2, O2)

    # bf16 operands + f32 accumulation -> compare against the f32 reference
    # with loosened tolerances.
    ref_arc = biaffine_reference(x, y, w_arc)
    ref_rel = biaffine_reference(x, y, w_rel)
    ref_2 = biaffine_reference(x2, y2, w2)
    assert jnp.allclose(s_arc, ref_arc, atol=5e-2, rtol=5e-2)
    assert jnp.allclose(s_rel, ref_rel, atol=5e-2, rtol=5e-2)
    assert jnp.allclose(s2, ref_2, atol=5e-2, rtol=5e-2)

    print("KERNEL_OK")
</pallas_src>

<mosaic_0001>
module attributes {stable_mosaic.version = 11 : i64} {
  func.func @_biaffine_kernel(%arg0: i32, %arg1: i32, %arg2: memref<16x128xbf16, #tpu.memory_space<vmem>>, %arg3: memref<2x128x128xbf16, #tpu.memory_space<vmem>>, %arg4: memref<128x128xbf16, #tpu.memory_space<vmem>>, %arg5: memref<2x1x8x128xf32, #tpu.memory_space<vmem>>) attributes {dimension_semantics = [#tpu.dimension_semantics<parallel>, #tpu.dimension_semantics<parallel>], iteration_bounds = array<i64: 1, 1>, scalar_prefetch = 0 : i64, scratch_operands = 0 : i64, tpu.core_type = #tpu.core_type<tc>, window_params = [{transform_indices = @transform_0, window_bounds = array<i64: 16, 128>}, {transform_indices = @transform_1, window_bounds = array<i64: 2, 128, 128>}, {transform_indices = @transform_2, window_bounds = array<i64: 128, 128>}, {transform_indices = @transform_3, window_bounds = array<i64: 2, 1, 8, 128>}]} {
    %c0 = arith.constant 0 : index
    %c0_0 = arith.constant 0 : index
    %0 = vector.load %arg2[%c0, %c0_0] : memref<16x128xbf16, #tpu.memory_space<vmem>>, vector<16x128xbf16>
    %c0_1 = arith.constant 0 : index
    %c0_2 = arith.constant 0 : index
    %1 = vector.load %arg4[%c0_1, %c0_2] : memref<128x128xbf16, #tpu.memory_space<vmem>>, vector<128x128xbf16>
    %cst = arith.constant dense<0.000000e+00> : vector<16x128xf32>
    %2 = tpu.matmul %0, %1, %cst {dimension_numbers = #tpu.dot_dimension_numbers<[1], [0], [0], [1], [0, 0, 1, 1], [], []>} : vector<16x128xbf16>, vector<128x128xbf16>, vector<16x128xf32> -> vector<16x128xf32>
    %3 = arith.truncf %2 : vector<16x128xf32> to vector<16x128xbf16>
    %c0_3 = arith.constant 0 : index
    %c0_4 = arith.constant 0 : index
    %c0_5 = arith.constant 0 : index
    %4 = vector.load %arg3[%c0_3, %c0_4, %c0_5] : memref<2x128x128xbf16, #tpu.memory_space<vmem>>, vector<1x128x128xbf16>
    %5 = vector.shape_cast %4 : vector<1x128x128xbf16> to vector<128x128xbf16>
    %6 = vector.extract_strided_slice %3 {offsets = [0, 0], sizes = [8, 128], strides = [1, 1]} : vector<16x128xbf16> to vector<8x128xbf16>
    %cst_6 = arith.constant dense<0.000000e+00> : vector<8x128xf32>
    %7 = tpu.matmul %6, %5, %cst_6 {dimension_numbers = #tpu.dot_dimension_numbers<[1], [0], [0], [1], [0, 0, 1, 1], [], []>} : vector<8x128xbf16>, vector<128x128xbf16>, vector<8x128xf32> -> vector<8x128xf32>
    %c0_7 = arith.constant 0 : index
    %c0_8 = arith.constant 0 : index
    %c0_9 = arith.constant 0 : index
    %c0_10 = arith.constant 0 : index
    %8 = vector.load %arg5[%c0_7, %c0_8, %c0_9, %c0_10] : memref<2x1x8x128xf32, #tpu.memory_space<vmem>>, vector<1x1x8x128xf32>
    %9 = vector.shape_cast %8 : vector<1x1x8x128xf32> to vector<8x128xf32>
    %10 = vector.shape_cast %7 : vector<8x128xf32> to vector<1x1x8x128xf32>
    tpu.vector_store %arg5[%c0_7, %c0_8, %c0_9, %c0_10], %10 {strides = array<i32>} : memref<2x1x8x128xf32, #tpu.memory_space<vmem>>, vector<1x1x8x128xf32>,
    %c1 = arith.constant 1 : index
    %c0_11 = arith.constant 0 : index
    %c0_12 = arith.constant 0 : index
    %11 = vector.load %arg3[%c1, %c0_11, %c0_12] : memref<2x128x128xbf16, #tpu.memory_space<vmem>>, vector<1x128x128xbf16>
    %12 = vector.shape_cast %11 : vector<1x128x128xbf16> to vector<128x128xbf16>
    %13 = vector.extract_strided_slice %3 {offsets = [8, 0], sizes = [8, 128], strides = [1, 1]} : vector<16x128xbf16> to vector<8x128xbf16>
    %cst_13 = arith.constant dense<0.000000e+00> : vector<8x128xf32>
    %14 = tpu.matmul %13, %12, %cst_13 {dimension_numbers = #tpu.dot_dimension_numbers<[1], [0], [0], [1], [0, 0, 1, 1], [], []>} : vector<8x128xbf16>, vector<128x128xbf16>, vector<8x128xf32> -> vector<8x128xf32>
    %c1_14 = arith.constant 1 : index
    %c0_15 = arith.constant 0 : index
    %c0_16 = arith.constant 0 : index
    %c0_17 = arith.constant 0 : index
    %15 = vector.load %arg5[%c1_14, %c0_15, %c0_16, %c0_17] : memref<2x1x8x128xf32, #tpu.memory_space<vmem>>, vector<1x1x8x128xf32>
    %16 = vector.shape_cast %15 : vector<1x1x8x128xf32> to vector<8x128xf32>
    %17 = vector.shape_cast %14 : vector<8x128xf32> to vector<1x1x8x128xf32>
    tpu.vector_store %arg5[%c1_14, %c0_15, %c0_16, %c0_17], %17 {strides = array<i32>} : memref<2x1x8x128xf32, #tpu.memory_space<vmem>>, vector<1x1x8x128xf32>,
    return
  }
  func.func @transform_0(%arg0: i32, %arg1: i32) -> (i32, i32) {
    %c0_i32 = arith.constant 0 : i32
    %c0_i32_0 = arith.constant 0 : i32
    return %arg1, %c0_i32 : i32, i32
  }
  func.func @transform_1(%arg0: i32, %arg1: i32) -> (i32, i32, i32) {
    %c0_i32 = arith.constant 0 : i32
    %c0_i32_0 = arith.constant 0 : i32
    %c0_i32_1 = arith.constant 0 : i32
    return %arg1, %c0_i32, %c0_i32_0 : i32, i32, i32
  }
  func.func @transform_2(%arg0: i32, %arg1: i32) -> (i32, i32) {
    %c0_i32 = arith.constant 0 : i32
    %c0_i32_0 = arith.constant 0 : i32
    return %c0_i32, %arg0 : i32, i32
  }
  func.func @transform_3(%arg0: i32, %arg1: i32) -> (i32, i32, i32, i32) {
    %c0_i32 = arith.constant 0 : i32
    %c0_i32_0 = arith.constant 0 : i32
    %c0_i32_1 = arith.constant 0 : i32
    return %arg1, %arg0, %c0_i32, %c0_i32_0 : i32, i32, i32, i32
  }
}

</mosaic_0001>

<bundles_post_ra>
// kernel: biaffine_forward.1
= control target key start
LH: loop header
LB: loop body
LE: loop exit
PB: predicated region body
PF: predicated region fallthrough
CT: control target
= control target key end

     0   :  { %s507_s2 = inlined_call_operand.vmem [shape: bf16[128,128], index: 2, kind: input, shape index: {}]   ;;  %s508_s1 = inlined_call_operand.vmem [shape: bf16[2,128,128], index: 1, kind: input, shape index: {}]   ;;  %s509_s0 = inlined_call_operand.vmem [shape: bf16[16,128], index: 0, kind: input, shape index: {}]   ;;  %s510_s3 = inlined_call_operand.vmem [shape: f32[2,1,8,128], index: 3, kind: output, shape index: {}]  }
   0x1   :  { %v389_v0 = vld [vmem:[%s507_s2 + $0x38] sm:$0xff]  ;;  %v388_v1 = vld [vmem:[%s507_s2 + $0x30] sm:$0xff]  ;;  %v387_v5 = vld [vmem:[%s507_s2 + $0x28] sm:$0xff] }
   0x2   :  { %86 = vmatpush.bf16.msra.mxu0 %v389_v0  ;;  %v397_v2 = vld [vmem:[%s508_s1 + $0x38] sm:$0xff]  ;;  %v396_v4 = vld [vmem:[%s508_s1 + $0x30] sm:$0xff]  ;;  %v395_v7 = vld [vmem:[%s508_s1 + $0x28] sm:$0xff] }
   0x3   :  { %v405_v3 = vld [vmem:[%s508_s1 + $0x78] sm:$0xff]  ;;  %166 = vmatpush.bf16.msra.mxu1 %v397_v2  ;;  %v404_v6 = vld [vmem:[%s508_s1 + $0x70] sm:$0xff]  ;;  %v386_v8 = vld [vmem:[%s507_s2 + $0x20] sm:$0xff] }
   0x4   :  { %245 = vmatpush.bf16.msra.mxu2 %v405_v3  ;;  %v403_v9 = vld [vmem:[%s508_s1 + $0x68] sm:$0xff]  ;;  %v394_v10 = vld [vmem:[%s508_s1 + $0x20] sm:$0xff]  ;;  %v385_v11 = vld [vmem:[%s507_s2 + $0x18] sm:$0xff] }
   0x5   :  { %v402_v12 = vld [vmem:[%s508_s1 + $0x60] sm:$0xff]  ;;  %v393_v13 = vld [vmem:[%s508_s1 + $0x18] sm:$0xff]  ;;  %v384_v14 = vld [vmem:[%s507_s2 + $0x10] sm:$0xff] }
   0x6   :  { %87 = vmatpush.bf16.msra.mxu0 %v388_v1  ;;  %v401_v15 = vld [vmem:[%s508_s1 + $0x58] sm:$0xff]  ;;  %v392_v16 = vld [vmem:[%s508_s1 + $0x10] sm:$0xff]  ;;  %v383_v17 = vld [vmem:[%s507_s2 + $0x8] sm:$0xff] }
   0x7   :  { %167 = vmatpush.bf16.msra.mxu1 %v396_v4  ;;  %v391_v18 = vld [vmem:[%s508_s1 + $0x8] sm:$0xff]  ;;  %v382_v19 = vld [vmem:[%s507_s2] sm:$0xff]  ;;  %v400_v22 = vld [vmem:[%s508_s1 + $0x50] sm:$0xff] }
   0x8   :  { %246 = vmatpush.bf16.msra.mxu2 %v404_v6  ;;  %v381_v20 = vld [vmem:[%s509_s0] sm:$0xff]  ;;  %v399_v23 = vld [vmem:[%s508_s1 + $0x48] sm:$0xff] }
   0x9   :  { %v390_v21 = vld [vmem:[%s508_s1] sm:$0xff] }
   0xa   :  { %88 = vmatpush.bf16.msra.mxu0 %v387_v5  ;;  %v398_v24 = vld [vmem:[%s508_s1 + $0x40] sm:$0xff] }
   0xb   :  { %168 = vmatpush.bf16.msra.mxu1 %v395_v7 }
   0xc   :  { %247 = vmatpush.bf16.msra.mxu2 %v403_v9 }
   0xe   :  { %89 = vmatpush.bf16.msra.mxu0 %v386_v8 }
   0xf   :  { %169 = vmatpush.bf16.msra.mxu1 %v394_v10 }
  0x10   :  { %248 = vmatpush.bf16.msra.mxu2 %v402_v12 }
  0x12   :  { %90 = vmatpush.bf16.msra.mxu0 %v385_v11 }
  0x13   :  { %170 = vmatpush.bf16.msra.mxu1 %v393_v13 }
  0x14   :  { %249 = vmatpush.bf16.msra.mxu2 %v401_v15 }
  0x16   :  { %91 = vmatpush.bf16.msra.mxu0 %v384_v14 }
  0x17   :  { %171 = vmatpush.bf16.msra.mxu1 %v392_v16 }
  0x18   :  { %250 = vmatpush.bf16.msra.mxu2 %v400_v22 }
  0x1a   :  { %92 = vmatpush.bf16.msra.mxu0 %v383_v17 }
  0x1b   :  { %172 = vmatpush.bf16.msra.mxu1 %v391_v18 }
  0x1c   :  { %251 = vmatpush.bf16.msra.mxu2 %v399_v23 }
  0x1e   :  { %93 = vmatpush.bf16.msra.mxu0 %v382_v19 }
  0x1f   :  { %173 = vmatpush.bf16.msra.mxu1 %v390_v21 }
  0x20   :  { %252 = vmatpush.bf16.msra.mxu2 %v398_v24 }
  0x21   :  { %94 = vmatmul.bf16.vlgmr.msra.gmra.mxu0 %v381_v20 }
  0x9e   :  { %v95_v25 = vpop.f32.mrf.mxu0 }
  0x9f   :  { %v100_v26 = vpack.c.bf16 %v95_v25, %v95_v25 }
  0xa1   :  { %174 = vmatmul.bf16.vlgmr.msra.gmra.mxu1 %v100_v26 }
  0xa6   :  { %v97_v27 = vpop.f32.mrf.mxu0 }
  0xa7   :  { %v101_v28 = vpack.c.bf16 %v97_v27, %v97_v27 }
  0xa9   :  { %253 = vmatmul.bf16.vlgmr.msra.gmra.mxu2 %v101_v28 }
 0x11e   :  { %v175_v29 = vpop.f32.mrf.mxu1 }
 0x11f   :  { %179 = vst [vmem:[%s510_s3] sm:$0xff] %v175_v29 }
 0x126   :  { %v177_v30 = vpop.f32.mrf.mxu1 }
 0x12c   :  { %v254_v31 = vpop.f32.mrf.mxu2 }
 0x12d   :  { %380 = vst [vmem:[%s510_s3 + $0x8] sm:$0xff] %v254_v31 }
 0x134   :  { %v256_v32 = vpop.f32.mrf.mxu2 }

</bundles_post_ra>
